<compile_context>
chip_gen: v7x
topology: tpu7x:2x2x1
jax: 0.10.0
libtpu: 0.0.40
codegen_flags: <defaults>
</compile_context>

<pallas_src>
import functools

import jax
import jax.numpy as jnp
from jax import lax
from jax.experimental import pallas as pl
from jax.experimental.pallas import tpu as pltpu


_SINGLE_SHOT_MAX_HIDDEN = 16384   # below this, grid-step overhead dominates
_K_BLOCK_TARGET = 32768           # upper bound on lanes per K step
_N_SPLIT = 2                      # leading parallel axis (v7x megacore)


def _round_up(v, m):
    return (v + m - 1) // m * m


def _single_shot_kernel(x_ref, w_ref, o_ref):
    # x_ref: (M, H), w_ref: (N, H)  ->  o_ref: (M, N) == x @ W^T.
    # Both loads are lane-dense; the MXU handles the RHS transposition.
    o_ref[...] = lax.dot_general(
        x_ref[...],
        w_ref[...],
        dimension_numbers=(((1,), (1,)), ((), ())),
        preferred_element_type=jnp.float32,
    ).astype(o_ref.dtype)


def _kgrid_kernel(x_ref, w_ref, o_ref, *, hidden, h_blk, k_per_split, mask_last):
    # Grid: (split s: "parallel", K step k: "arbitrary").
    # o_ref (M, N) is the resident f32 accumulator for split s; (M, h_blk)
    # and (N, h_blk) blocks of x / W stream over K (double-buffered by
    # Pallas), overlapping HBM DMA with the MXU work.
    s = pl.program_id(0)
    k = pl.program_id(1)
    x = x_ref[...]
    w = w_ref[...]
    if mask_last:
        # Only the globally-last K block is partial; zero its OOB lanes on
        # both operands so the DMA'd garbage past `hidden` contributes 0.
        start = (s * k_per_split + k) * h_blk
        valid = hidden - start                      # >= h_blk except last block
        lane = lax.broadcasted_iota(jnp.int32, (1, h_blk), 1)
        keep = lane < valid
        x = jnp.where(keep, x, 0.0)
        w = jnp.where(keep, w, 0.0)

    part = lax.dot_general(
        x,
        w,
        dimension_numbers=(((1,), (1,)), ((), ())),
        preferred_element_type=jnp.float32,
    )

    @pl.when(k == 0)
    def _():
        o_ref[...] = part

    @pl.when(k != 0)
    def _():
        o_ref[...] += part


def _linear_no_bias_impl(x, weight):
    """x: (batch, seq, H); weight: (out_features, H) in PyTorch layout.

    Returns (batch, seq, out_features), matching nn.Linear(H, out, bias=False).
    """
    batch, seq, hidden = x.shape
    out_features, hidden_w = weight.shape
    assert hidden == hidden_w

    m = batch * seq
    x2d = x.reshape(m, hidden)

    itemsize = jnp.dtype(x.dtype).itemsize
    cost = pl.CostEstimate(
        flops=2 * m * out_features * hidden,
        transcendentals=0,
        bytes_accessed=(m * hidden + out_features * hidden) * itemsize
        + m * out_features * 4,
    )
    m_v = _round_up(m, 8)
    n_v = _round_up(out_features, 8)

    if hidden <= _SINGLE_SHOT_MAX_HIDDEN:
        # Whole problem fits comfortably in VMEM: one invocation, no grid.
        h_pad = _round_up(hidden, 128)
        footprint = (m_v * h_pad + n_v * h_pad + m_v * 128) * 4
        vmem_limit = min(max(int(footprint * 1.25) + (2 << 20), 8 << 20), 32 << 20)
        y2d = pl.pallas_call(
            _single_shot_kernel,
            out_shape=jax.ShapeDtypeStruct((m, out_features), jnp.float32),
            in_specs=[
                pl.BlockSpec(memory_space=pltpu.MemorySpace.VMEM),
                pl.BlockSpec(memory_space=pltpu.MemorySpace.VMEM),
            ],
            out_specs=pl.BlockSpec(memory_space=pltpu.MemorySpace.VMEM),
            compiler_params=pltpu.CompilerParams(vmem_limit_bytes=vmem_limit),
            cost_estimate=cost,
        )(x2d, weight)
        return y2d.astype(x.dtype).reshape(batch, seq, out_features)

    # Large hidden: pipeline the HBM stream of x / W against the MXU by
    # reducing over K blocks, split 2-way for the v7x megacore.
    k_per_split = max(1, pl.cdiv(pl.cdiv(hidden, _N_SPLIT), _K_BLOCK_TARGET))
    n_k = _N_SPLIT * k_per_split
    h_blk = _round_up(pl.cdiv(hidden, n_k), 512)
    # Only the last K block may be partial (handled by in-kernel masking).
    assert (n_k - 1) * h_blk < hidden
    mask_last = (n_k * h_blk) != hidden

    # Double-buffered x/W blocks + resident per-split output + slack.
    footprint = 2 * (m_v + n_v) * h_blk * 4 + 2 * m_v * 128 * 4
    vmem_limit = min(max(int(footprint * 1.25) + (2 << 20), 8 << 20), 32 << 20)

    def x_index_map(s, k):
        return (0, s * k_per_split + k)

    def w_index_map(s, k):
        return (0, s * k_per_split + k)

    def o_index_map(s, k):
        return (s, 0, 0)

    kernel = functools.partial(
        _kgrid_kernel,
        hidden=hidden,
        h_blk=h_blk,
        k_per_split=k_per_split,
        mask_last=mask_last,
    )

    y_parts = pl.pallas_call(
        kernel,
        out_shape=jax.ShapeDtypeStruct((_N_SPLIT, m, out_features), jnp.float32),
        grid_spec=pltpu.PrefetchScalarGridSpec(
            num_scalar_prefetch=0,
            grid=(_N_SPLIT, k_per_split),
            in_specs=[
                pl.BlockSpec((m, h_blk), x_index_map),
                pl.BlockSpec((out_features, h_blk), w_index_map),
            ],
            out_specs=pl.BlockSpec((None, m, out_features), o_index_map),
        ),
        compiler_params=pltpu.CompilerParams(
            dimension_semantics=("parallel", "arbitrary"),
            vmem_limit_bytes=vmem_limit,
        ),
        cost_estimate=cost,
    )(x2d, weight)

    # Tiny (_N_SPLIT, m, out_features) combine of the per-core partial sums.
    y2d = jnp.sum(y_parts, axis=0)
    return y2d.astype(x.dtype).reshape(batch, seq, out_features)


linear_no_bias = jax.jit(_linear_no_bias_impl)


if __name__ == "__main__":
    key = jax.random.PRNGKey(0)
    kx1, kw1, kx2, kw2 = jax.random.split(key, 4)

    batch, seq, out_features = 2, 3, 10

    # --- Small hidden: exercises the single-shot (no-grid) path. ---
    hidden_small = 2048
    x_s = jax.random.normal(kx1, (batch, seq, hidden_small), dtype=jnp.float32)
    bound_s = 1.0 / (hidden_small ** 0.5)
    w_s = jax.random.uniform(
        kw1, (out_features, hidden_small), dtype=jnp.float32,
        minval=-bound_s, maxval=bound_s,
    )
    y_s = jax.block_until_ready(linear_no_bias(x_s, w_s))
    ref_s = jnp.einsum("bsh,oh->bso", x_s, w_s)
    assert y_s.shape == (batch, seq, out_features)
    assert jnp.allclose(y_s, ref_s, atol=1e-3, rtol=1e-3)

    # --- Larger hidden (not a multiple of the K block): exercises the
    #     pipelined K-grid path, the 2-way parallel split, and the
    #     partial-block lane mask. ---
    hidden_big = 20000
    x_b = jax.random.normal(kx2, (batch, seq, hidden_big), dtype=jnp.float32)
    bound_b = 1.0 / (hidden_big ** 0.5)
    w_b = jax.random.uniform(
        kw2, (out_features, hidden_big), dtype=jnp.float32,
        minval=-bound_b, maxval=bound_b,
    )
    y_b = jax.block_until_ready(linear_no_bias(x_b, w_b))
    ref_b = jnp.einsum("bsh,oh->bso", x_b, w_b)
    assert y_b.shape == (batch, seq, out_features)
    assert jnp.allclose(y_b, ref_b, atol=5e-3, rtol=5e-3)

    print("KERNEL_OK")
</pallas_src>

<mosaic_0001>
module attributes {stable_mosaic.version = 11 : i64} {
  func.func @_single_shot_kernel(%arg0: memref<6x2048xf32, #tpu.memory_space<vmem>>, %arg1: memref<10x2048xf32, #tpu.memory_space<vmem>>, %arg2: memref<6x10xf32, #tpu.memory_space<vmem>>) attributes {dimension_semantics = [], scalar_prefetch = 0 : i64, scratch_operands = 0 : i64, tpu.core_type = #tpu.core_type<tc>} {
    %c0 = arith.constant 0 : index
    %c0_0 = arith.constant 0 : index
    %0 = vector.load %arg0[%c0, %c0_0] : memref<6x2048xf32, #tpu.memory_space<vmem>>, vector<6x2048xf32>
    %c0_1 = arith.constant 0 : index
    %c0_2 = arith.constant 0 : index
    %1 = vector.load %arg1[%c0_1, %c0_2] : memref<10x2048xf32, #tpu.memory_space<vmem>>, vector<10x2048xf32>
    %cst = arith.constant dense<0.000000e+00> : vector<6x10xf32>
    %2 = tpu.matmul %0, %1, %cst {dimension_numbers = #tpu.dot_dimension_numbers<[1], [1], [0], [0], [0, 0, 1, 0], [], []>} : vector<6x2048xf32>, vector<10x2048xf32>, vector<6x10xf32> -> vector<6x10xf32>
    %c0_3 = arith.constant 0 : index
    %c0_4 = arith.constant 0 : index
    %3 = vector.load %arg2[%c0_3, %c0_4] : memref<6x10xf32, #tpu.memory_space<vmem>>, vector<6x10xf32>
    tpu.vector_store %arg2[%c0_3, %c0_4], %2 {strides = array<i32>} : memref<6x10xf32, #tpu.memory_space<vmem>>, vector<6x10xf32>,
    return
  }
}

</mosaic_0001>

<bundles_post_ra>
// kernel: _linear_no_bias_impl.1
= control target key start
LH: loop header
LB: loop body
LE: loop exit
PB: predicated region body
PF: predicated region fallthrough
CT: control target
= control target key end

     0   :  { %vm619_vm0 = vcmask 78848   ;;  %s832_s1 = inlined_call_operand.vmem [shape: f32[10,2048], index: 1, kind: input, shape index: {}]   ;;  %s833_s0 = inlined_call_operand.vmem [shape: f32[6,2048], index: 0, kind: input, shape index: {}]   ;;  %s834_s2 = inlined_call_operand.vmem [shape: f32[6,10], index: 2, kind: output, shape index: {}]  }
   0x1   :  { %v28_v0 = vld [vmem:[%s832_s1 + $0x8] sm:$0xff]  ;;  %v27_v5 = vld [vmem:[%s832_s1] sm:$0xff]  ;;  %v30_v14 = vld [vmem:[%s832_s1 + $0x18] sm:$0xff] }
   0x2   :  { %v44_v1 = vld [vmem:[%s832_s1 + $0x88] sm:$0x3]  ;;  %v43_v6 = vld [vmem:[%s832_s1 + $0x80] sm:$0x3]  ;;  %v46_v15 = vld [vmem:[%s832_s1 + $0x98] sm:$0x3] }
   0x3   :  { %v36_v2 = vld [vmem:[%s832_s1 + $0x48] sm:$0xff]  ;;  %v625_v3 = vpack.c.bf16 %v44_v1, %v28_v0  ;;  %v627_v8 = vpack.c.bf16 %v43_v6, %v27_v5  ;;  %v35_v9 = vld [vmem:[%s832_s1 + $0x40] sm:$0xff]  ;;  %v38_v16 = vld [vmem:[%s832_s1 + $0x58] sm:$0xff]  ;;  %v629_v17 = vpack.c.bf16 %v46_v15, %v30_v14 }
   0x4   :  { %v52_v4 = vld [vmem:[%s832_s1 + $0xc8] sm:$0x3]  ;;  %v51_v10 = vld [vmem:[%s832_s1 + $0xc0] sm:$0x3]  ;;  %v54_v18 = vld [vmem:[%s832_s1 + $0xd8] sm:$0x3] }
   0x5   :  { %v641_v7 = vpack.c.bf16 %v52_v4, %v36_v2  ;;  %v12_v11 = vld [vmem:[%s833_s0 + $0x8] sm:$0x3f]  ;;  %626 = vmatprep.subr.bf16.mxu1 %v625_v3  ;;  %v643_v12 = vpack.c.bf16 %v51_v10, %v35_v9  ;;  %v29_v19 = vld [vmem:[%s832_s1 + $0x10] sm:$0xff]  ;;  %v645_v21 = vpack.c.bf16 %v54_v18, %v38_v16  ;;  %v11_v25 = vld [vmem:[%s833_s0] sm:$0x3f] }
   0x6   :  { %123 = vmatprep.mubr.f32.mxu1 %v12_v11  ;;  %v20_v13 = vld [vmem:[%s833_s0 + $0x48] sm:$0x3f]  ;;  %628 = vmatpush1.bf16.xpose.msra.mxu1 %v627_v8  ;;  %v45_v20 = vld [vmem:[%s832_s1 + $0x90] sm:$0x3]  ;;  %v19_v29 = vld [vmem:[%s833_s0 + $0x40] sm:$0x3f] }
   0x7   :  { %642 = vmatprep.subr.bf16.mxu0 %v641_v7  ;;  %403 = vmatprep.mubr.f32.mxu0 %v20_v13  ;;  %v37_v22 = vld [vmem:[%s832_s1 + $0x50] sm:$0xff]  ;;  %v32_v24 = vld [vmem:[%s832_s1 + $0x28] sm:$0xff]  ;;  %v631_v26 = vpack.c.bf16 %v45_v20, %v29_v19  ;;  %v14_v32 = vld [vmem:[%s833_s0 + $0x18] sm:$0x3f] }
   0x8   :  { %644 = vmatpush1.bf16.xpose.msra.mxu0 %v643_v12  ;;  %v53_v23 = vld [vmem:[%s832_s1 + $0xd0] sm:$0x3]  ;;  %630 = vmatprep.subr.bf16.mxu1 %v629_v17  ;;  %v48_v27 = vld [vmem:[%s832_s1 + $0xa8] sm:$0x3]  ;;  %v22_v34 = vld [vmem:[%s833_s0 + $0x58] sm:$0x3f] }
   0x9   :  { %646 = vmatprep.subr.bf16.mxu0 %v645_v21  ;;  %v40_v28 = vld [vmem:[%s832_s1 + $0x68] sm:$0xff]  ;;  %v647_v30 = vpack.c.bf16 %v53_v23, %v37_v22  ;;  %v633_v33 = vpack.c.bf16 %v48_v27, %v32_v24  ;;  %v31_v36 = vld [vmem:[%s832_s1 + $0x20] sm:$0xff]  ;;  %v34_v40 = vld [vmem:[%s832_s1 + $0x38] sm:$0xff] }
   0xa   :  { %v56_v31 = vld [vmem:[%s832_s1 + $0xe8] sm:$0x3]  ;;  %v47_v37 = vld [vmem:[%s832_s1 + $0xa0] sm:$0x3]  ;;  %v50_v41 = vld [vmem:[%s832_s1 + $0xb8] sm:$0x3] }
   0xb   :  { %v649_v35 = vpack.c.bf16 %v56_v31, %v40_v28  ;;  %v39_v38 = vld [vmem:[%s832_s1 + $0x60] sm:$0xff]  ;;  %v13_v42 = vld [vmem:[%s833_s0 + $0x10] sm:$0x3f]  ;;  %v635_v43 = vpack.c.bf16 %v47_v37, %v31_v36  ;;  %v42_v44 = vld [vmem:[%s832_s1 + $0x78] sm:$0xff]  ;;  %v637_v49 = vpack.c.bf16 %v50_v41, %v34_v40 }
   0xc   :  { %v55_v39 = vld [vmem:[%s832_s1 + $0xe0] sm:$0x3]  ;;  %v58_v45 = vld [vmem:[%s832_s1 + $0xf8] sm:$0x3]  ;;  %v21_v46 = vld [vmem:[%s833_s0 + $0x50] sm:$0x3f] }
   0xd   :  { %124 = vmatmul.mubr.f32.vlgmr.msra.gmra.mrb[0].mxu1 %v11_v25  ;;  %v651_v47 = vpack.c.bf16 %v55_v39, %v39_v38  ;;  %v16_v48 = vld [vmem:[%s833_s0 + $0x28] sm:$0x3f]  ;;  %v653_v51 = vpack.c.bf16 %v58_v45, %v42_v44  ;;  %v33_v52 = vld [vmem:[%s832_s1 + $0x30] sm:$0xff]  ;;  %v15_v56 = vld [vmem:[%s833_s0 + $0x20] sm:$0x3f] }
   0xe   :  { %632 = vmatpush1.bf16.xpose.msra.mxu1 %v631_v26  ;;  %193 = vmatprep.mubr.f32.mxu1 %v14_v32  ;;  %v24_v50 = vld [vmem:[%s833_s0 + $0x68] sm:$0x3f]  ;;  %v49_v53 = vld [vmem:[%s832_s1 + $0xb0] sm:$0x3]  ;;  %v23_v58 = vld [vmem:[%s833_s0 + $0x60] sm:$0x3f] }
   0xf   :  { %404 = vmatmul.mubr.f32.vlgmr.msra.gmra.mrb[0].mxu0 %v19_v29  ;;  %634 = vmatprep.subr.bf16.mxu1 %v633_v33  ;;  %v41_v54 = vld [vmem:[%s832_s1 + $0x70] sm:$0xff]  ;;  %v639_v57 = vpack.c.bf16 %v49_v53, %v33_v52  ;;  %v18_v60 = vld [vmem:[%s833_s0 + $0x38] sm:$0x3f] }
  0x10   :  { %648 = vmatpush1.bf16.xpose.msra.mxu0 %v647_v30  ;;  %473 = vmatprep.mubr.f32.mxu0 %v22_v34  ;;  %v57_v55 = vld [vmem:[%s832_s1 + $0xf0] sm:$0x3]  ;;  %v26_v61 = vld [vmem:[%s833_s0 + $0x78] sm:$0x3f] }
  0x11   :  { %650 = vmatprep.subr.bf16.mxu0 %v649_v35  ;;  %v655_v59 = vpack.c.bf16 %v57_v55, %v41_v54  ;;  %v17_v62 = vld [vmem:[%s833_s0 + $0x30] sm:$0x3f] }
  0x12   :  { %v25_v63 = vld [vmem:[%s833_s0 + $0x70] sm:$0x3f] }
  0x15   :  { %194 = vmatmul.mubr.f32.vlgmr.msra.gmra.mrb[0].mxu1 %v13_v42 }
  0x16   :  { %636 = vmatpush1.bf16.xpose.msra.mxu1 %v635_v43  ;;  %263 = vmatprep.mubr.f32.mxu1 %v16_v48 }
  0x17   :  { %474 = vmatmul.mubr.f32.vlgmr.msra.gmra.mrb[0].mxu0 %v21_v46  ;;  %638 = vmatprep.subr.bf16.mxu1 %v637_v49 }
  0x18   :  { %652 = vmatpush1.bf16.xpose.msra.mxu0 %v651_v47  ;;  %543 = vmatprep.mubr.f32.mxu0 %v24_v50 }
  0x19   :  { %654 = vmatprep.subr.bf16.mxu0 %v653_v51 }
  0x1d   :  { %264 = vmatmul.mubr.f32.vlgmr.msra.gmra.mrb[0].mxu1 %v15_v56 }
  0x1e   :  { %640 = vmatpush1.bf16.xpose.msra.mxu1 %v639_v57  ;;  %333 = vmatprep.mubr.f32.mxu1 %v18_v60 }
  0x1f   :  { %544 = vmatmul.mubr.f32.vlgmr.msra.gmra.mrb[0].mxu0 %v23_v58 }
  0x20   :  { %656 = vmatpush1.bf16.xpose.msra.mxu0 %v655_v59  ;;  %613 = vmatprep.mubr.f32.mxu0 %v26_v61 }
  0x25   :  { %334 = vmatmul.mubr.f32.vlgmr.msra.gmra.mrb[0].mxu1 %v17_v62 }
  0x27   :  { %614 = vmatmul.mubr.f32.vlgmr.msra.gmra.mrb[0].mxu0 %v25_v63 }
  0xf8   :  { %v335_v0 = vpop.f32.mrb[0].mxu1 }
  0xf9   :  { %v337_v2 = vpop.f32.mrb[1].mxu1 }
  0xfa   :  { %v615_v1 = vpop.f32.mrb[0].mxu0 }
  0xfb   :  { %v657_v3 = vadd.f32 %v615_v1, %v335_v0  ;;  %v617_v4 = vpop.f32.mrb[1].mxu0 }
  0xfd   :  { %620 = vst.msk [vmem:[%s834_s2] sm:$0x3f] %vm619_vm0, %v657_v3 }

</bundles_post_ra>
